<compile_context>
chip_gen: v7x
topology: tpu7x:2x2x1
jax: 0.10.0
libtpu: 0.0.40
codegen_flags: <defaults>
</compile_context>

<pallas_src>
import functools

import jax
import jax.numpy as jnp
from jax.experimental import pallas as pl
from jax.experimental.pallas import tpu as pltpu


LANE_TARGET = 128        # lane width target; 256 is also valid on v6e/v7x
MAX_SUBLANE_STACK = 8    # images stacked along sublanes per grid step


# ----------------------------------------------------------------------------
# Fused kernel: (conv3x3 + folded-BN + ReLU) -> (conv3x3 + folded-BN) +
# residual -> ReLU.  Several images per grid step, everything kept in vregs.
# ----------------------------------------------------------------------------
def _fused_kernel(x_ref, w_ref, b_ref, o_ref, *, kh, pad, H):
    # x_ref : (S*H, L)        f32 activations, L = lane_pack*W*C (lane-interleaved)
    # w_ref : (2, kh, L, L)   bf16 folded-BN block-diagonal band weights
    # b_ref : (2, L)          f32 folded-BN bias (tiled across W and lane groups)
    # o_ref : (S*H, L)        f32 output
    x = x_ref[...]
    rows, lanes = x.shape

    # Row index within each stacked image: zero the rows a sublane roll pulls
    # across an image boundary (this is the implicit H-axis zero padding).
    row_in_img = jax.lax.broadcasted_iota(jnp.int32, (rows, lanes), 0) % H
    masks = {}
    for dy in range(kh):
        d = dy - pad
        if d < 0:
            masks[d] = row_in_img >= (-d)
        elif d > 0:
            masks[d] = row_in_img < (H - d)

    def conv_bn(layer, act_f32):
        acc = jnp.zeros((rows, lanes), jnp.float32)
        for dy in range(kh):
            d = dy - pad
            if d == 0:
                shifted = act_f32
            else:
                # shifted[r, :] = act[r + d, :]   (rows outside the image -> 0)
                rolled = pltpu.roll(act_f32, shift=(-d) % rows, axis=0)
                shifted = jnp.where(masks[d], rolled, 0.0)
            acc = acc + jnp.dot(shifted.astype(jnp.bfloat16),
                                w_ref[layer, dy, :, :],
                                preferred_element_type=jnp.float32)
        return acc + b_ref[layer:layer + 1, :]

    h = jnp.maximum(conv_bn(0, x), 0.0)            # Conv2d -> BN -> ReLU
    out = jnp.maximum(conv_bn(1, h) + x, 0.0)      # Conv2d -> BN, +residual, ReLU
    o_ref[...] = out.astype(o_ref.dtype)


# ----------------------------------------------------------------------------
# One-time (per-weights) precompute: BN fold, band matrices, bias tiling.
# ----------------------------------------------------------------------------
def _fold_bn(gamma, beta, mean, var, eps=1e-5):
    scale = gamma / jnp.sqrt(var + eps)
    shift = beta - mean * scale
    return scale, shift


def prepare_unet2d_convx(params, *, C, H, W):
    kh, kw, pad = 3, 3, 1
    f32 = jnp.float32
    WC = W * C
    lane_pack = max(1, LANE_TARGET // WC)

    s1, b1 = _fold_bn(*params["bn1"])
    s2, b2 = _fold_bn(*params["bn2"])
    wf = jnp.stack([params["w1"] * s1[None, None, None, :],
                    params["w2"] * s2[None, None, None, :]])            # (2,kh,kw,Ci,Co)

    # Band matrices B[l,dy, wp*C+ci, w*C+co] = wf[l,dy, wp-w+pad, ci, co]
    # (zero when wp-w+pad leaves the kernel window -> implicit W padding).
    wi = jnp.arange(W)
    dxs = jnp.arange(kw)[:, None, None]
    Pm = (wi[None, :, None] == wi[None, None, :] + dxs - pad).astype(f32)  # (kw,W,W)
    band = jnp.einsum("xpw,lyxio->lypiwo", Pm, wf).reshape(2, kh, WC, WC)

    # Block-diagonal replication across the lane-packed images, bf16 for the MXU.
    band = jnp.einsum("pq,lyij->lypiqj", jnp.eye(lane_pack, dtype=band.dtype),
                      band).reshape(2, kh, lane_pack * WC, lane_pack * WC)
    band = band.astype(jnp.bfloat16)

    bias = jnp.stack([jnp.tile(b1, lane_pack * W),
                      jnp.tile(b2, lane_pack * W)]).astype(f32)          # (2, lane_pack*WC)
    return band, bias


# ----------------------------------------------------------------------------
# Module forward (layout packing + single fused pallas_call)
# ----------------------------------------------------------------------------
def unet2d_convx_forward(x_nchw, band, bias):
    N, C, H, W = x_nchw.shape
    WC = W * C
    L = band.shape[-1]
    lane_pack = L // WC
    kh = band.shape[1]
    pad = (kh - 1) // 2

    # Images per grid step: lane_pack along lanes x sublane_stack along sublanes.
    sublane_stack = min(MAX_SUBLANE_STACK, pl.cdiv(N, lane_pack))
    per_block = lane_pack * sublane_stack
    G = pl.cdiv(N, per_block)
    Npad = G * per_block
    if Npad != N:
        x_nchw = jnp.concatenate(
            [x_nchw, jnp.zeros((Npad - N, C, H, W), x_nchw.dtype)], axis=0)

    # (Npad,C,H,W) -> (G,S,H,P,W,C) -> (G*S*H, P*W*C): one transpose, lane-dense slab.
    xs = x_nchw.reshape(G, sublane_stack, lane_pack, C, H, W)
    xs = jnp.transpose(xs, (0, 1, 4, 2, 5, 3))
    xs = xs.reshape(G * sublane_stack * H, L).astype(jnp.float32)

    SH = sublane_stack * H
    kern = functools.partial(_fused_kernel, kh=kh, pad=pad, H=H)
    out = pl.pallas_call(
        kern,
        out_shape=jax.ShapeDtypeStruct((G * SH, L), jnp.float32),
        grid_spec=pltpu.PrefetchScalarGridSpec(
            num_scalar_prefetch=0,
            grid=(G,),
            in_specs=[
                pl.BlockSpec((SH, L), lambda g: (g, 0)),
                pl.BlockSpec(band.shape, lambda g: (0, 0, 0, 0)),   # resident weights
                pl.BlockSpec(bias.shape, lambda g: (0, 0)),         # resident bias
            ],
            out_specs=pl.BlockSpec((SH, L), lambda g: (g, 0)),
        ),
        compiler_params=pltpu.CompilerParams(
            dimension_semantics=("parallel",)),   # batch blocks -> 2 TCs on v7x
    )(xs, band, bias)

    # Inverse layout plumbing: (G*S*H, L) -> (Npad,C,H,W) -> [:N]
    y = out.reshape(G, sublane_stack, H, lane_pack, W, C)
    y = jnp.transpose(y, (0, 1, 3, 5, 2, 4)).reshape(Npad, C, H, W)
    return y[:N].astype(x_nchw.dtype)


# ----------------------------------------------------------------------------
# Pure-JAX f32 reference (for correctness check)
# ----------------------------------------------------------------------------
def _conv_ref(x_nhwc, w_hwio, pad):
    return jax.lax.conv_general_dilated(
        x_nhwc, w_hwio, window_strides=(1, 1),
        padding=((pad, pad), (pad, pad)),
        dimension_numbers=("NHWC", "HWIO", "NHWC"))


def reference_forward(x_nchw, params):
    x = jnp.transpose(x_nchw, (0, 2, 3, 1))
    residual = x
    s1, b1 = _fold_bn(*params["bn1"])
    s2, b2 = _fold_bn(*params["bn2"])
    h = jnp.maximum(_conv_ref(x, params["w1"], 1) * s1 + b1, 0.0)
    out = _conv_ref(h, params["w2"], 1) * s2 + b2
    out = jnp.maximum(out + residual, 0.0)
    return jnp.transpose(out, (0, 3, 1, 2))


# ----------------------------------------------------------------------------
if __name__ == "__main__":
    key = jax.random.PRNGKey(0)
    ks = jax.random.split(key, 5)

    N, C, H, W = 2, 4, 16, 16  # in_size = out_size = 4 (residual, no downsample)
    x_nchw = jax.random.normal(ks[0], (N, C, H, W), jnp.float32)

    def bn_params(k):
        ka, kb, kc, kd = jax.random.split(k, 4)
        gamma = jax.random.uniform(ka, (C,), minval=0.5, maxval=1.5)
        beta = 0.1 * jax.random.normal(kb, (C,))
        mean = 0.1 * jax.random.normal(kc, (C,))
        var = jax.random.uniform(kd, (C,), minval=0.5, maxval=1.5)
        return (gamma, beta, mean, var)

    params = {
        "w1": 0.2 * jax.random.normal(ks[1], (3, 3, C, C), jnp.float32),
        "w2": 0.2 * jax.random.normal(ks[2], (3, 3, C, C), jnp.float32),
        "bn1": bn_params(ks[3]),
        "bn2": bn_params(ks[4]),
    }

    # Weight-dependent precompute is hoisted out of the per-call forward.
    band, bias = prepare_unet2d_convx(params, C=C, H=H, W=W)

    fwd = jax.jit(unet2d_convx_forward)
    out = fwd(x_nchw, band, bias)
    out = jax.block_until_ready(out)

    ref = reference_forward(x_nchw, params)
    # bf16 MXU operands (f32 accumulation) -> relaxed tolerance vs f32 reference.
    if not jnp.allclose(out, ref, atol=1e-1, rtol=5e-2):
        max_err = float(jnp.max(jnp.abs(out - ref)))
        raise AssertionError(
            f"Pallas kernel output mismatch vs reference (max abs err {max_err})")

    print("KERNEL_OK")
</pallas_src>

<mosaic_0001>
module attributes {stable_mosaic.version = 11 : i64} {
  func.func @_fused_kernel(%arg0: i32, %arg1: memref<16x128xf32, #tpu.memory_space<vmem>>, %arg2: memref<2x3x128x128xbf16, #tpu.memory_space<vmem>>, %arg3: memref<2x128xf32, #tpu.memory_space<vmem>>, %arg4: memref<16x128xf32, #tpu.memory_space<vmem>>) attributes {dimension_semantics = [#tpu.dimension_semantics<parallel>], iteration_bounds = array<i64: 1>, scalar_prefetch = 0 : i64, scratch_operands = 0 : i64, tpu.core_type = #tpu.core_type<tc>, window_params = [{transform_indices = @transform_0, window_bounds = array<i64: 16, 128>}, {pipeline_mode = #tpu.pipeline_mode<synchronous>, transform_indices = @transform_1, window_bounds = array<i64: 2, 3, 128, 128>}, {pipeline_mode = #tpu.pipeline_mode<synchronous>, transform_indices = @transform_2, window_bounds = array<i64: 2, 128>}, {transform_indices = @transform_3, window_bounds = array<i64: 16, 128>}]} {
    %c0 = arith.constant 0 : index
    %c0_0 = arith.constant 0 : index
    %0 = vector.load %arg1[%c0, %c0_0] : memref<16x128xf32, #tpu.memory_space<vmem>>, vector<16x128xf32>
    %1 = tpu.iota {dimensions = array<i32: 0>} : vector<16x128xi32>
    %c16_i32 = arith.constant 16 : i32
    %c0_i32 = arith.constant 0 : i32
    %2 = arith.cmpi eq, %c16_i32, %c0_i32 : i32
    %c1_i32 = arith.constant 1 : i32
    %3 = arith.select %2, %c1_i32, %c16_i32 : i32
    %4 = vector.broadcast %3 : i32 to vector<16x128xi32>
    %5 = arith.remsi %1, %4 : vector<16x128xi32>
    %c0_i32_1 = arith.constant 0 : i32
    %6 = vector.broadcast %c0_i32_1 : i32 to vector<16x128xi32>
    %7 = arith.cmpi ne, %5, %6 : vector<16x128xi32>
    %c0_i32_2 = arith.constant 0 : i32
    %8 = vector.broadcast %c0_i32_2 : i32 to vector<16x128xi32>
    %9 = arith.cmpi slt, %5, %8 : vector<16x128xi32>
    %c0_i32_3 = arith.constant 0 : i32
    %10 = arith.cmpi slt, %3, %c0_i32_3 : i32
    %11 = vector.broadcast %10 : i1 to vector<16x128xi1>
    %12 = vector.broadcast %11 : vector<16x128xi1> to vector<16x128xi1>
    %13 = arith.xori %9, %12 : vector<16x128xi1>
    %14 = arith.andi %13, %7 : vector<16x128xi1>
    %15 = vector.broadcast %3 : i32 to vector<16x128xi32>
    %16 = arith.addi %5, %15 : vector<16x128xi32>
    %17 = arith.select %14, %16, %5 : vector<16x128xi1>, vector<16x128xi32>
    %c1_i32_4 = arith.constant 1 : i32
    %18 = vector.broadcast %c1_i32_4 : i32 to vector<16x128xi32>
    %19 = arith.cmpi sge, %17, %18 : vector<16x128xi32>
    %c15_i32 = arith.constant 15 : i32
    %20 = vector.broadcast %c15_i32 : i32 to vector<16x128xi32>
    %21 = arith.cmpi slt, %17, %20 : vector<16x128xi32>
    %cst = arith.constant 0.000000e+00 : f32
    %22 = vector.broadcast %cst : f32 to vector<16x128xf32>
    %c1_i32_5 = arith.constant 1 : i32
    %23 = tpu.dynamic_rotate %0 by %c1_i32_5 dim 0 : vector<16x128xf32>, i32 -> vector<16x128xf32>
    %cst_6 = arith.constant 0.000000e+00 : f32
    %24 = vector.broadcast %cst_6 : f32 to vector<16x128xf32>
    %25 = arith.select %19, %23, %24 : vector<16x128xi1>, vector<16x128xf32>
    %26 = arith.truncf %25 : vector<16x128xf32> to vector<16x128xbf16>
    %c0_7 = arith.constant 0 : index
    %c0_8 = arith.constant 0 : index
    %c0_9 = arith.constant 0 : index
    %c0_10 = arith.constant 0 : index
    %27 = vector.load %arg2[%c0_7, %c0_8, %c0_9, %c0_10] : memref<2x3x128x128xbf16, #tpu.memory_space<vmem>>, vector<1x1x128x128xbf16>
    %28 = vector.shape_cast %27 : vector<1x1x128x128xbf16> to vector<128x128xbf16>
    %cst_11 = arith.constant dense<0.000000e+00> : vector<16x128xf32>
    %29 = tpu.matmul %26, %28, %cst_11 {dimension_numbers = #tpu.dot_dimension_numbers<[1], [0], [0], [1], [0, 0, 1, 1], [], []>} : vector<16x128xbf16>, vector<128x128xbf16>, vector<16x128xf32> -> vector<16x128xf32>
    %30 = arith.addf %22, %29 : vector<16x128xf32>
    %31 = arith.truncf %0 : vector<16x128xf32> to vector<16x128xbf16>
    %c0_12 = arith.constant 0 : index
    %c1 = arith.constant 1 : index
    %c0_13 = arith.constant 0 : index
    %c0_14 = arith.constant 0 : index
    %32 = vector.load %arg2[%c0_12, %c1, %c0_13, %c0_14] : memref<2x3x128x128xbf16, #tpu.memory_space<vmem>>, vector<1x1x128x128xbf16>
    %33 = vector.shape_cast %32 : vector<1x1x128x128xbf16> to vector<128x128xbf16>
    %cst_15 = arith.constant dense<0.000000e+00> : vector<16x128xf32>
    %34 = tpu.matmul %31, %33, %cst_15 {dimension_numbers = #tpu.dot_dimension_numbers<[1], [0], [0], [1], [0, 0, 1, 1], [], []>} : vector<16x128xbf16>, vector<128x128xbf16>, vector<16x128xf32> -> vector<16x128xf32>
    %35 = arith.addf %30, %34 : vector<16x128xf32>
    %c15_i32_16 = arith.constant 15 : i32
    %36 = tpu.dynamic_rotate %0 by %c15_i32_16 dim 0 : vector<16x128xf32>, i32 -> vector<16x128xf32>
    %cst_17 = arith.constant 0.000000e+00 : f32
    %37 = vector.broadcast %cst_17 : f32 to vector<16x128xf32>
    %38 = arith.select %21, %36, %37 : vector<16x128xi1>, vector<16x128xf32>
    %39 = arith.truncf %38 : vector<16x128xf32> to vector<16x128xbf16>
    %c0_18 = arith.constant 0 : index
    %c2 = arith.constant 2 : index
    %c0_19 = arith.constant 0 : index
    %c0_20 = arith.constant 0 : index
    %40 = vector.load %arg2[%c0_18, %c2, %c0_19, %c0_20] : memref<2x3x128x128xbf16, #tpu.memory_space<vmem>>, vector<1x1x128x128xbf16>
    %41 = vector.shape_cast %40 : vector<1x1x128x128xbf16> to vector<128x128xbf16>
    %cst_21 = arith.constant dense<0.000000e+00> : vector<16x128xf32>
    %42 = tpu.matmul %39, %41, %cst_21 {dimension_numbers = #tpu.dot_dimension_numbers<[1], [0], [0], [1], [0, 0, 1, 1], [], []>} : vector<16x128xbf16>, vector<128x128xbf16>, vector<16x128xf32> -> vector<16x128xf32>
    %43 = arith.addf %35, %42 : vector<16x128xf32>
    %c0_22 = arith.constant 0 : index
    %c0_23 = arith.constant 0 : index
    %44 = vector.load %arg3[%c0_22, %c0_23] : memref<2x128xf32, #tpu.memory_space<vmem>>, vector<1x128xf32>
    %45 = vector.broadcast %44 : vector<1x128xf32> to vector<16x128xf32>
    %46 = arith.addf %43, %45 : vector<16x128xf32>
    %cst_24 = arith.constant 0.000000e+00 : f32
    %47 = vector.broadcast %cst_24 : f32 to vector<16x128xf32>
    %48 = arith.maximumf %46, %47 : vector<16x128xf32>
    %cst_25 = arith.constant 0.000000e+00 : f32
    %49 = vector.broadcast %cst_25 : f32 to vector<16x128xf32>
    %c1_i32_26 = arith.constant 1 : i32
    %50 = tpu.dynamic_rotate %48 by %c1_i32_26 dim 0 : vector<16x128xf32>, i32 -> vector<16x128xf32>
    %cst_27 = arith.constant 0.000000e+00 : f32
    %51 = vector.broadcast %cst_27 : f32 to vector<16x128xf32>
    %52 = arith.select %19, %50, %51 : vector<16x128xi1>, vector<16x128xf32>
    %53 = arith.truncf %52 : vector<16x128xf32> to vector<16x128xbf16>
    %c1_28 = arith.constant 1 : index
    %c0_29 = arith.constant 0 : index
    %c0_30 = arith.constant 0 : index
    %c0_31 = arith.constant 0 : index
    %54 = vector.load %arg2[%c1_28, %c0_29, %c0_30, %c0_31] : memref<2x3x128x128xbf16, #tpu.memory_space<vmem>>, vector<1x1x128x128xbf16>
    %55 = vector.shape_cast %54 : vector<1x1x128x128xbf16> to vector<128x128xbf16>
    %cst_32 = arith.constant dense<0.000000e+00> : vector<16x128xf32>
    %56 = tpu.matmul %53, %55, %cst_32 {dimension_numbers = #tpu.dot_dimension_numbers<[1], [0], [0], [1], [0, 0, 1, 1], [], []>} : vector<16x128xbf16>, vector<128x128xbf16>, vector<16x128xf32> -> vector<16x128xf32>
    %57 = arith.addf %49, %56 : vector<16x128xf32>
    %58 = arith.truncf %48 : vector<16x128xf32> to vector<16x128xbf16>
    %c1_33 = arith.constant 1 : index
    %c1_34 = arith.constant 1 : index
    %c0_35 = arith.constant 0 : index
    %c0_36 = arith.constant 0 : index
    %59 = vector.load %arg2[%c1_33, %c1_34, %c0_35, %c0_36] : memref<2x3x128x128xbf16, #tpu.memory_space<vmem>>, vector<1x1x128x128xbf16>
    %60 = vector.shape_cast %59 : vector<1x1x128x128xbf16> to vector<128x128xbf16>
    %cst_37 = arith.constant dense<0.000000e+00> : vector<16x128xf32>
    %61 = tpu.matmul %58, %60, %cst_37 {dimension_numbers = #tpu.dot_dimension_numbers<[1], [0], [0], [1], [0, 0, 1, 1], [], []>} : vector<16x128xbf16>, vector<128x128xbf16>, vector<16x128xf32> -> vector<16x128xf32>
    %62 = arith.addf %57, %61 : vector<16x128xf32>
    %c15_i32_38 = arith.constant 15 : i32
    %63 = tpu.dynamic_rotate %48 by %c15_i32_38 dim 0 : vector<16x128xf32>, i32 -> vector<16x128xf32>
    %cst_39 = arith.constant 0.000000e+00 : f32
    %64 = vector.broadcast %cst_39 : f32 to vector<16x128xf32>
    %65 = arith.select %21, %63, %64 : vector<16x128xi1>, vector<16x128xf32>
    %66 = arith.truncf %65 : vector<16x128xf32> to vector<16x128xbf16>
    %c1_40 = arith.constant 1 : index
    %c2_41 = arith.constant 2 : index
    %c0_42 = arith.constant 0 : index
    %c0_43 = arith.constant 0 : index
    %67 = vector.load %arg2[%c1_40, %c2_41, %c0_42, %c0_43] : memref<2x3x128x128xbf16, #tpu.memory_space<vmem>>, vector<1x1x128x128xbf16>
    %68 = vector.shape_cast %67 : vector<1x1x128x128xbf16> to vector<128x128xbf16>
    %cst_44 = arith.constant dense<0.000000e+00> : vector<16x128xf32>
    %69 = tpu.matmul %66, %68, %cst_44 {dimension_numbers = #tpu.dot_dimension_numbers<[1], [0], [0], [1], [0, 0, 1, 1], [], []>} : vector<16x128xbf16>, vector<128x128xbf16>, vector<16x128xf32> -> vector<16x128xf32>
    %70 = arith.addf %62, %69 : vector<16x128xf32>
    %c1_45 = arith.constant 1 : index
    %c0_46 = arith.constant 0 : index
    %71 = vector.load %arg3[%c1_45, %c0_46] : memref<2x128xf32, #tpu.memory_space<vmem>>, vector<1x128xf32>
    %72 = vector.broadcast %71 : vector<1x128xf32> to vector<16x128xf32>
    %73 = arith.addf %70, %72 : vector<16x128xf32>
    %74 = arith.addf %73, %0 : vector<16x128xf32>
    %cst_47 = arith.constant 0.000000e+00 : f32
    %75 = vector.broadcast %cst_47 : f32 to vector<16x128xf32>
    %76 = arith.maximumf %74, %75 : vector<16x128xf32>
    %c0_48 = arith.constant 0 : index
    %c0_49 = arith.constant 0 : index
    %77 = vector.load %arg4[%c0_48, %c0_49] : memref<16x128xf32, #tpu.memory_space<vmem>>, vector<16x128xf32>
    tpu.vector_store %arg4[%c0_48, %c0_49], %76 {strides = array<i32>} : memref<16x128xf32, #tpu.memory_space<vmem>>, vector<16x128xf32>,
    return
  }
  func.func @transform_0(%arg0: i32) -> (i32, i32) {
    %c0_i32 = arith.constant 0 : i32
    %c0_i32_0 = arith.constant 0 : i32
    return %arg0, %c0_i32 : i32, i32
  }
  func.func @transform_1(%arg0: i32) -> (i32, i32, i32, i32) {
    %c0_i32 = arith.constant 0 : i32
    %c0_i32_0 = arith.constant 0 : i32
    %c0_i32_1 = arith.constant 0 : i32
    %c0_i32_2 = arith.constant 0 : i32
    %c0_i32_3 = arith.constant 0 : i32
    return %c0_i32, %c0_i32_0, %c0_i32_1, %c0_i32_2 : i32, i32, i32, i32
  }
  func.func @transform_2(%arg0: i32) -> (i32, i32) {
    %c0_i32 = arith.constant 0 : i32
    %c0_i32_0 = arith.constant 0 : i32
    %c0_i32_1 = arith.constant 0 : i32
    return %c0_i32, %c0_i32_0 : i32, i32
  }
  func.func @transform_3(%arg0: i32) -> (i32, i32) {
    %c0_i32 = arith.constant 0 : i32
    %c0_i32_0 = arith.constant 0 : i32
    return %arg0, %c0_i32 : i32, i32
  }
}

</mosaic_0001>

<bundles_post_ra>
// kernel: unet2d_convx_forward.1
= control target key start
LH: loop header
LB: loop body
LE: loop exit
PB: predicated region body
PF: predicated region fallthrough
CT: control target
= control target key end

     0   :  { %v1112_v0 = vmov 0.0   ;;  %vm1113_vm0 = vmmov 0   ;;  %v17_v8 = vlaneseq  ;;  %vm1114_vm3 = vmmov 1   ;;  %s1409_s1 = inlined_call_operand.vmem [shape: bf16[2,3,128,128], index: 1, kind: input, shape index: {}]   ;;  %s1410_s0 = inlined_call_operand.vmem [shape: f32[16,128], index: 0, kind: input, shape index: {}]   ;;  %s1411_s2 = inlined_call_operand.vmem [shape: f32[2,128], index: 2, kind: input, shape index: {}]   ;;  %s1412_s3 = inlined_call_operand.vmem [shape: f32[16,128], index: 3, kind: output, shape index: {}]  }
   0x1   :  { %941 = vmatprep.subr.bf16.mxu0 %v1112_v0  ;;  %961 = vmatprep.subr.bf16.mxu1 %v1112_v0  ;;  %v1064_v1 = vld [vmem:[%s1409_s1 + $0x40] sm:$0xff]   ;;  %v1066_v3 = vld [vmem:[%s1409_s1 + $0x48] sm:$0xff]   ;;  %v1068_v5 = vld [vmem:[%s1409_s1 + $0x50] sm:$0xff]  }
   0x2   :  { %v1065_v2 = vld [vmem:[%s1409_s1] sm:$0xff]   ;;  %957 = vmatprep.mubr.msk.bf16.mxu0 %vm1113_vm0, %v1112_v0  ;;  %977 = vmatprep.mubr.msk.bf16.mxu1 %vm1113_vm0, %v1112_v0  ;;  %v1067_v4 = vld [vmem:[%s1409_s1 + $0x8] sm:$0xff]   ;;  %v1069_v6 = vld [vmem:[%s1409_s1 + $0x10] sm:$0xff]   ;;  %v1174_v11 = vshrl.u32 %v17_v8, 7 }
   0x3   :  { %942 = vmatpush3.bf16.msra.mxu0 %v1064_v1  ;;  %962 = vmatpush3.bf16.msra.mxu1 %v1065_v2  ;;  %v1070_v7 = vld [vmem:[%s1409_s1 + $0x58] sm:$0xff]   ;;  %v1072_v10 = vld [vmem:[%s1409_s1 + $0x60] sm:$0xff]   ;;  %v1074_v13 = vld [vmem:[%s1409_s1 + $0x68] sm:$0xff]  }
   0x4   :  { %943 = vmatprep.subr.bf16.mxu0 %v1112_v0  ;;  %963 = vmatprep.subr.bf16.mxu1 %v1112_v0  ;;  %v1071_v9 = vld [vmem:[%s1409_s1 + $0x18] sm:$0xff]   ;;  %v1073_v12 = vld [vmem:[%s1409_s1 + $0x20] sm:$0xff]   ;;  %v1075_v14 = vld [vmem:[%s1409_s1 + $0x28] sm:$0xff]   ;;  %v24_v16 = vand.u32 15, %v1174_v11  ;;  %vm50_vm2 = vcmp.lt.s32.totalorder %v1174_v11, 1  ;;  %v19_v35 = vadd.s32 8, %v1174_v11 }
   0x5   :  { %v1190_v15 = vld [vmem:[%s1410_s0] sm:$0xff]  ;;  %v1198_v17 = vld [vmem:[%s1410_s0 + $0x8] sm:$0xff]  ;;  %v1076_v18 = vld [vmem:[%s1409_s1 + $0x70] sm:$0xff]   ;;  %vm270_vm5 = vcmp.lt.s32.totalorder %v1174_v11, 7 }
   0x6   :  { %v1077_v19 = vld [vmem:[%s1409_s1 + $0x30] sm:$0xff]   ;;  %vm44_vm1 = vcmp.ge.s32.totalorder %v24_v16, 1  ;;  %v48_v20 = vrot.slane %v1190_v15, 7  ;;  %v49_v21 = vrot.slane %v1198_v17, 7  ;;  %v1078_v22 = vld [vmem:[%s1409_s1 + $0x78] sm:$0xff]   ;;  %v1080_v27 = vld [vmem:[%s1409_s1 + $0x80] sm:$0xff]   ;;  %v72_v28 = vpack.c.bf16 %v1198_v17, %v1190_v15 }
   0x7   :  { %944 = vmatpush3.bf16.msra.mxu0 %v1066_v3  ;;  %964 = vmatpush3.bf16.msra.mxu1 %v1067_v4  ;;  %v1079_v23 = vld [vmem:[%s1409_s1 + $0x38] sm:$0xff]   ;;  %vm1218_vm4 = vmpackc.low %vm1114_vm3, %vm44_vm1  ;;  %v1081_v30 = vld [vmem:[%s1409_s1 + $0x88] sm:$0xff]   ;;  %v268_v36 = vrot.slane %v1190_v15, 1  ;;  %v269_v37 = vrot.slane %v1198_v17, 1  ;;  %v31_v39 = vand.u32 15, %v19_v35 }
   0x8   :  { %945 = vmatprep.subr.bf16.mxu0 %v1112_v0  ;;  %965 = vmatprep.subr.bf16.mxu1 %v1112_v0  ;;  %v51_v25 = vsel %vm50_vm2, %v48_v20, %v49_v21  ;;  %v52_v26 = vsel %vm50_vm2, %v49_v21, %v48_v20  ;;  %v1082_v31 = vld [vmem:[%s1409_s1 + $0x90] sm:$0xff]   ;;  %v1083_v32 = vld [vmem:[%s1409_s1 + $0x98] sm:$0xff]   ;;  %v1084_v33 = vld [vmem:[%s1409_s1 + $0xa0] sm:$0xff]  }
   0x9   :  { %v778_v29 = vpack.c.bf16 %v51_v25, %v52_v26  ;;  %v1085_v34 = vld [vmem:[%s1409_s1 + $0xa8] sm:$0xff]   ;;  %v1086_v38 = vld [vmem:[%s1409_s1 + $0xb0] sm:$0xff]   ;;  %v1087_v40 = vld [vmem:[%s1409_s1 + $0xb8] sm:$0xff]   ;;  %v271_v41 = vsel %vm270_vm5, %v268_v36, %v269_v37  ;;  %v272_v42 = vsel %vm270_vm5, %v269_v37, %v268_v36  ;;  %vm47_vm6 = vcmp.lt.s32.totalorder %v31_v39, 15 }
   0xa   :  { %v805_v43 = vpack.c.bf16 %v272_v42, %v271_v41  ;;  %vm1278_vm7 = vmpackc.low %vm47_vm6, %vm1114_vm3  ;;  %v1088_v45 = vld [vmem:[%s1409_s1 + $0x100] sm:$0xff]   ;;  %v1089_v47 = vld [vmem:[%s1409_s1 + $0x108] sm:$0xff]  }
   0xb   :  { %946 = vmatpush3.bf16.msra.mxu0 %v1068_v5  ;;  %966 = vmatpush3.bf16.msra.mxu1 %v1069_v6  ;;  %v1090_v46 = vld [vmem:[%s1409_s1 + $0xc0] sm:$0xff]   ;;  %v1092_v48 = vld [vmem:[%s1409_s1 + $0xc8] sm:$0xff]   ;;  %v1091_v49 = vld [vmem:[%s1409_s1 + $0x110] sm:$0xff]  }
   0xc   :  { %947 = vmatprep.subr.bf16.mxu0 %v1112_v0  ;;  %967 = vmatprep.subr.bf16.mxu1 %v1112_v0  ;;  %v1094_v50 = vld [vmem:[%s1409_s1 + $0xd0] sm:$0xff]   ;;  %v1093_v51 = vld [vmem:[%s1409_s1 + $0x118] sm:$0xff]   ;;  %v1095_v53 = vld [vmem:[%s1409_s1 + $0x120] sm:$0xff]  }
   0xd   :  { %v1096_v52 = vld [vmem:[%s1409_s1 + $0xd8] sm:$0xff]   ;;  %v1098_v54 = vld [vmem:[%s1409_s1 + $0xe0] sm:$0xff]   ;;  %v1097_v55 = vld [vmem:[%s1409_s1 + $0x128] sm:$0xff]  }
   0xe   :  { %v1099_v56 = vld [vmem:[%s1409_s1 + $0x130] sm:$0xff]   ;;  %v1100_v57 = vld [vmem:[%s1409_s1 + $0xe8] sm:$0xff]   ;;  %v1101_v58 = vld [vmem:[%s1409_s1 + $0x138] sm:$0xff]  }
   0xf   :  { %948 = vmatpush3.bf16.msra.mxu0 %v1070_v7  ;;  %968 = vmatpush3.bf16.msra.mxu1 %v1071_v9  ;;  %v1102_v59 = vld [vmem:[%s1409_s1 + $0xf0] sm:$0xff]   ;;  %v1103_v60 = vld [vmem:[%s1409_s1 + $0xf8] sm:$0xff]   ;;  %v807_v9 = vld [vmem:[%s1411_s2] ss:$0 sm:$0xff] }
  0x10   :  { %949 = vmatprep.subr.bf16.mxu0 %v1112_v0  ;;  %969 = vmatprep.subr.bf16.mxu1 %v1112_v0  ;;  %v1106_v11 = vld [vmem:[%s1409_s1 + $0x150] sm:$0xff]   ;;  %v1107_v36 = vld [vmem:[%s1409_s1 + $0x158] sm:$0xff]   ;;  %v1108_v24 = vld [vmem:[%s1409_s1 + $0x160] sm:$0xff]  }
  0x11   :  { %v1109_v37 = vld [vmem:[%s1409_s1 + $0x168] sm:$0xff]   ;;  %v1111_v39 = vld [vmem:[%s1409_s1 + $0x178] sm:$0xff]  }
  0x13   :  { %950 = vmatpush3.bf16.msra.mxu0 %v1072_v10  ;;  %970 = vmatpush3.bf16.msra.mxu1 %v1073_v12 }
  0x14   :  { %951 = vmatprep.subr.bf16.mxu0 %v1112_v0  ;;  %971 = vmatprep.subr.bf16.mxu1 %v1112_v0 }
  0x17   :  { %952 = vmatpush3.bf16.msra.mxu0 %v1074_v13  ;;  %972 = vmatpush3.bf16.msra.mxu1 %v1075_v14 }
  0x18   :  { %953 = vmatprep.subr.bf16.mxu0 %v1112_v0  ;;  %973 = vmatprep.subr.bf16.mxu1 %v1112_v0 }
  0x1b   :  { %954 = vmatpush3.bf16.msra.mxu0 %v1076_v18  ;;  %974 = vmatpush3.bf16.msra.mxu1 %v1077_v19 }
  0x1c   :  { %955 = vmatprep.subr.bf16.mxu0 %v1112_v0  ;;  %975 = vmatprep.subr.bf16.mxu1 %v1112_v0 }
  0x1f   :  { %956 = vmatpush3.bf16.msra.mxu0 %v1078_v22  ;;  %976 = vmatpush3.bf16.msra.mxu1 %v1079_v23  ;;  %v1104_v23 = vld [vmem:[%s1409_s1 + $0x140] sm:$0xff]  }
  0x20   :  { %981 = vmatprep.subr.bf16.mxu0 %v1112_v0  ;;  %1001 = vmatprep.subr.bf16.mxu1 %v1112_v0 }
  0x22   :  { %958 = vmatmul.mubr.bf16.vlgmr.msra.gmra.mrb[0].mxu0 %v72_v28  ;;  %978 = vmatmul.mubr.msk.bf16.vlgmr.msra.gmra.mrb[0].mxu1 %vm1218_vm4, %v778_v29 }
  0x23   :  { %982 = vmatpush3.bf16.msra.mxu0 %v1080_v27  ;;  %997 = vmatprep.mubr.msk.bf16.mxu0 %vm1113_vm0, %v1112_v0 }
  0x24   :  { %983 = vmatprep.subr.bf16.mxu0 %v1112_v0  ;;  %1017 = vmatprep.mubr.msk.bf16.mxu1 %vm1113_vm0, %v1112_v0 }
  0x25   :  { %1002 = vmatpush3.bf16.msra.mxu1 %v1088_v45 }
  0x26   :  { %1003 = vmatprep.subr.bf16.mxu1 %v1112_v0 }
  0x27   :  { %984 = vmatpush3.bf16.msra.mxu0 %v1081_v30 }
  0x28   :  { %985 = vmatprep.subr.bf16.mxu0 %v1112_v0 }
  0x29   :  { %1004 = vmatpush3.bf16.msra.mxu1 %v1089_v47 }
  0x2a   :  { %1005 = vmatprep.subr.bf16.mxu1 %v1112_v0 }
  0x2b   :  { %986 = vmatpush3.bf16.msra.mxu0 %v1082_v31 }
  0x2c   :  { %987 = vmatprep.subr.bf16.mxu0 %v1112_v0 }
  0x2d   :  { %1006 = vmatpush3.bf16.msra.mxu1 %v1091_v49 }
  0x2e   :  { %1007 = vmatprep.subr.bf16.mxu1 %v1112_v0 }
  0x2f   :  { %988 = vmatpush3.bf16.msra.mxu0 %v1083_v32 }
  0x30   :  { %989 = vmatprep.subr.bf16.mxu0 %v1112_v0 }
  0x31   :  { %1008 = vmatpush3.bf16.msra.mxu1 %v1093_v51 }
  0x32   :  { %1009 = vmatprep.subr.bf16.mxu1 %v1112_v0 }
  0x33   :  { %990 = vmatpush3.bf16.msra.mxu0 %v1084_v33 }
  0x34   :  { %991 = vmatprep.subr.bf16.mxu0 %v1112_v0 }
  0x35   :  { %1010 = vmatpush3.bf16.msra.mxu1 %v1095_v53 }
  0x36   :  { %1011 = vmatprep.subr.bf16.mxu1 %v1112_v0 }
  0x37   :  { %992 = vmatpush3.bf16.msra.mxu0 %v1085_v34  ;;  %v1105_v34 = vld [vmem:[%s1409_s1 + $0x148] sm:$0xff]  }
  0x38   :  { %993 = vmatprep.subr.bf16.mxu0 %v1112_v0 }
  0x39   :  { %1012 = vmatpush3.bf16.msra.mxu1 %v1097_v55 }
  0x3a   :  { %1013 = vmatprep.subr.bf16.mxu1 %v1112_v0 }
  0x3b   :  { %994 = vmatpush3.bf16.msra.mxu0 %v1086_v38  ;;  %v1110_v38 = vld [vmem:[%s1409_s1 + $0x170] sm:$0xff]  }
  0x3c   :  { %995 = vmatprep.subr.bf16.mxu0 %v1112_v0 }
  0x3d   :  { %1014 = vmatpush3.bf16.msra.mxu1 %v1099_v56 }
  0x3e   :  { %1015 = vmatprep.subr.bf16.mxu1 %v1112_v0 }
  0x3f   :  { %996 = vmatpush3.bf16.msra.mxu0 %v1087_v40 }
  0x40   :  { %1021 = vmatprep.subr.bf16.mxu0 %v1112_v0 }
  0x41   :  { %1016 = vmatpush3.bf16.msra.mxu1 %v1101_v58 }
  0x42   :  { %998 = vmatmul.mubr.msk.bf16.vlgmr.msra.gmra.mrb[4].mxu0 %vm1278_vm7, %v805_v43  ;;  %1041 = vmatprep.subr.bf16.mxu1 %v1112_v0 }
  0x43   :  { %1037 = vmatprep.mubr.msk.bf16.mxu0 %vm1113_vm0, %v1112_v0  ;;  %1022 = vmatpush3.bf16.msra.mxu0 %v1090_v46 }
  0x44   :  { %1023 = vmatprep.subr.bf16.mxu0 %v1112_v0 }
  0x47   :  { %1024 = vmatpush3.bf16.msra.mxu0 %v1092_v48 }
  0x48   :  { %1025 = vmatprep.subr.bf16.mxu0 %v1112_v0 }
  0x4b   :  { %1026 = vmatpush3.bf16.msra.mxu0 %v1094_v50 }
  0x4c   :  { %1027 = vmatprep.subr.bf16.mxu0 %v1112_v0 }
  0x4f   :  { %1028 = vmatpush3.bf16.msra.mxu0 %v1096_v52  ;;  %v886_v52 = vld [vmem:[%s1411_s2 + $0x1] ss:$0 sm:$0xff] }
  0x50   :  { %1029 = vmatprep.subr.bf16.mxu0 %v1112_v0 }
  0x53   :  { %1030 = vmatpush3.bf16.msra.mxu0 %v1098_v54 }
  0x54   :  { %1031 = vmatprep.subr.bf16.mxu0 %v1112_v0 }
  0x57   :  { %1032 = vmatpush3.bf16.msra.mxu0 %v1100_v57 }
  0x58   :  { %1033 = vmatprep.subr.bf16.mxu0 %v1112_v0 }
  0x5b   :  { %1034 = vmatpush3.bf16.msra.mxu0 %v1102_v59 }
  0x5c   :  { %1035 = vmatprep.subr.bf16.mxu0 %v1112_v0 }
  0x5f   :  { %1036 = vmatpush3.bf16.msra.mxu0 %v1103_v60 }
  0xf5   :  { %v172_v61 = vpop.f32.mrb[0].mxu0  ;;  %v261_v62 = vpop.f32.mrb[0].mxu1 }
  0xf6   :  { %v959_v63 = vpop.f32.mrb[1].mxu0  ;;  %v262_v1 = vadd.f32 %v261_v62, %v172_v61  ;;  %v979_v2 = vpop.f32.mrb[1].mxu1 }
  0xf7   :  { %v175_v3 = vpop.f32.mrb[2].mxu0  ;;  %v264_v4 = vpop.f32.mrb[2].mxu1 }
  0xf8   :  { %v960_v5 = vpop.f32.mrb[3].mxu0  ;;  %v265_v6 = vadd.f32 %v264_v4, %v175_v3  ;;  %v980_v7 = vpop.f32.mrb[3].mxu1 }
 0x115   :  { %v375_v8 = vpop.f32.mrb[4].mxu0 }
 0x116   :  { %v382_v10 = vadd.f32 %v375_v8, %v262_v1  ;;  %v999_v12 = vpop.f32.mrb[5].mxu0 }
 0x117   :  { %v378_v13 = vpop.f32.mrb[6].mxu0 }
 0x118   :  { %v389_v14 = vadd.f32 %v807_v9, %v382_v10  ;;  %v383_v16 = vadd.f32 %v378_v13, %v265_v6  ;;  %v1000_v18 = vpop.f32.mrb[7].mxu0 }
 0x11a   :  { %v391_v19 = vmax.f32 %v389_v14, 0.0  ;;  %v390_v20 = vadd.f32 %v807_v9, %v383_v16 }
 0x11c   :  { %v392_v21 = vmax.f32 %v390_v20, 0.0  ;;  %v393_v22 = vrot.slane %v391_v19, 7  ;;  %v613_v25 = vrot.slane %v391_v19, 1 }
 0x11e   :  { %v394_v26 = vrot.slane %v392_v21, 7  ;;  %v614_v27 = vrot.slane %v392_v21, 1  ;;  %v417_v28 = vpack.c.bf16 %v392_v21, %v391_v19 }
 0x120   :  { %v395_v29 = vsel %vm50_vm2, %v393_v22, %v394_v26  ;;  %v396_v30 = vsel %vm50_vm2, %v394_v26, %v393_v22  ;;  %v615_v31 = vsel %vm270_vm5, %v613_v25, %v614_v27  ;;  %v616_v32 = vsel %vm270_vm5, %v614_v27, %v613_v25  ;;  %1018 = vmatmul.mubr.bf16.vlgmr.msra.gmra.mrb[4].mxu1 %v417_v28 }
 0x121   :  { %1042 = vmatpush3.bf16.msra.mxu1 %v1104_v23  ;;  %v857_v33 = vpack.c.bf16 %v395_v29, %v396_v30  ;;  %1057 = vmatprep.mubr.msk.bf16.mxu1 %vm1113_vm0, %v1112_v0  ;;  %v884_v35 = vpack.c.bf16 %v616_v32, %v615_v31 }
 0x122   :  { %1043 = vmatprep.subr.bf16.mxu1 %v1112_v0 }
 0x123   :  { %1038 = vmatmul.mubr.msk.bf16.vlgmr.msra.gmra.mrb[8].mxu0 %vm1218_vm4, %v857_v33 }
 0x125   :  { %1044 = vmatpush3.bf16.msra.mxu1 %v1105_v34 }
 0x126   :  { %1045 = vmatprep.subr.bf16.mxu1 %v1112_v0 }
 0x129   :  { %1046 = vmatpush3.bf16.msra.mxu1 %v1106_v11 }
 0x12a   :  { %1047 = vmatprep.subr.bf16.mxu1 %v1112_v0 }
 0x12d   :  { %1048 = vmatpush3.bf16.msra.mxu1 %v1107_v36 }
 0x12e   :  { %1049 = vmatprep.subr.bf16.mxu1 %v1112_v0 }
 0x131   :  { %1050 = vmatpush3.bf16.msra.mxu1 %v1108_v24 }
 0x132   :  { %1051 = vmatprep.subr.bf16.mxu1 %v1112_v0 }
 0x135   :  { %1052 = vmatpush3.bf16.msra.mxu1 %v1109_v37 }
 0x136   :  { %1053 = vmatprep.subr.bf16.mxu1 %v1112_v0 }
 0x139   :  { %1054 = vmatpush3.bf16.msra.mxu1 %v1110_v38 }
 0x13a   :  { %1055 = vmatprep.subr.bf16.mxu1 %v1112_v0 }
 0x13d   :  { %1056 = vmatpush3.bf16.msra.mxu1 %v1111_v39 }
 0x140   :  { %1058 = vmatmul.mubr.msk.bf16.vlgmr.msra.gmra.mrb[8].mxu1 %vm1278_vm7, %v884_v35 }
 0x1f3   :  { %v517_v40 = vpop.f32.mrb[4].mxu1 }
 0x1f4   :  { %v1019_v41 = vpop.f32.mrb[5].mxu1 }
 0x1f5   :  { %v520_v42 = vpop.f32.mrb[6].mxu1 }
 0x1f6   :  { %v1020_v43 = vpop.f32.mrb[7].mxu1  ;;  %v606_v45 = vpop.f32.mrb[8].mxu0 }
 0x1f7   :  { %v607_v46 = vadd.f32 %v606_v45, %v517_v40  ;;  %v1039_v47 = vpop.f32.mrb[9].mxu0 }
 0x1f8   :  { %v609_v48 = vpop.f32.mrb[10].mxu0 }
 0x1f9   :  { %v610_v49 = vadd.f32 %v609_v48, %v520_v42  ;;  %v1040_v50 = vpop.f32.mrb[11].mxu0 }
 0x213   :  { %v719_v51 = vpop.f32.mrb[8].mxu1 }
 0x214   :  { %v726_v0 = vadd.f32 %v719_v51, %v607_v46  ;;  %v1059_v53 = vpop.f32.mrb[9].mxu1 }
 0x215   :  { %v722_v54 = vpop.f32.mrb[10].mxu1 }
 0x216   :  { %v733_v44 = vadd.f32 %v886_v52, %v726_v0  ;;  %v727_v55 = vadd.f32 %v722_v54, %v610_v49  ;;  %v1060_v56 = vpop.f32.mrb[11].mxu1 }
 0x218   :  { %v735_v57 = vadd.f32 %v733_v44, %v1190_v15  ;;  %v734_v58 = vadd.f32 %v886_v52, %v727_v55 }
 0x21a   :  { %v737_v59 = vmax.f32 %v735_v57, 0.0  ;;  %v736_v60 = vadd.f32 %v734_v58, %v1198_v17 }
 0x21c   :  { %739 = vst [vmem:[%s1412_s3] sm:$0xff] %v737_v59  ;;  %v738_v61 = vmax.f32 %v736_v60, 0.0 }
 0x21e   :  { %740 = vst [vmem:[%s1412_s3 + $0x8] sm:$0xff] %v738_v61 }

</bundles_post_ra>
